<compile_context>
chip_gen: v7x
topology: tpu7x:2x2x1
jax: 0.10.0
libtpu: 0.0.40
codegen_flags: <defaults>
</compile_context>

<pallas_src>
import jax
import jax.numpy as jnp
from jax.experimental import pallas as pl
from jax.experimental.pallas import tpu as pltpu


def _pixel_shuffle_1d_kernel(x_ref, p_ref, o_ref):
    # x_ref: (bt, C, Wt)   p_ref: (r*Wt, r*Wt) one-hot   o_ref: (bt, C//r, r*Wt)
    bt, C, Wt = x_ref.shape
    cl = o_ref.shape[1]
    r = C // cl
    for i in range(bt):              # static unroll over the batch tile
        acc = None
        for u in range(r):           # static unroll over the upscale factor
            xu = x_ref[i, u * cl:(u + 1) * cl, :]        # (cl, Wt)
            pu = p_ref[u * Wt:(u + 1) * Wt, :]           # (Wt, r*Wt), one-hot
            part = jnp.dot(xu, pu, preferred_element_type=jnp.float32)
            acc = part if acc is None else acc + part
        o_ref[i] = acc.astype(o_ref.dtype)


def _pick_width_tile(W, r):
    """Width tile: lane-dense output (r*Wt multiple of 128) with bounded MXU work."""
    target = max(128, 512 // r)
    if W <= target:
        return W                     # full width -> full-dim block, always legal
    if W % 128 != 0:
        return W                     # keep full width to satisfy the (8,128)/full-dim rule
    k = target - (target % 128)
    while k >= 128:
        if W % k == 0:
            return k
        k -= 128
    return W


def _pick_batch_tile(B, C, Wt, itemsize):
    """Fold batch elements so each grid step moves a reasonable amount of data."""
    budget = 512 * 1024              # per-block input-bytes target
    cap = max(1, budget // max(C * Wt * itemsize, 1))
    cap = min(cap, 8)                # keep the static unroll small
    bt = 1
    for d in range(1, B + 1):
        if B % d == 0 and d <= cap:
            bt = d
    return bt


def pixel_shuffle_1d(x, upscale_factor):
    """Pallas TPU implementation of PixelShuffle1D.forward. x: (B, C, W), float dtype."""
    B, C, W = x.shape
    r = int(upscale_factor)
    if C % r != 0:
        raise ValueError("channel count must be divisible by upscale_factor")
    if not jnp.issubdtype(x.dtype, jnp.floating):
        # TODO(synk): integer dtypes need a copy-based (non-MXU) shuffle path
        # (the v7x MXU has no integer datapath).
        raise NotImplementedError("pixel_shuffle_1d kernel supports float dtypes only")

    cl = C // r
    lw = r * W
    itemsize = jnp.dtype(x.dtype).itemsize

    Wt = _pick_width_tile(W, r)
    bt = _pick_batch_tile(B, C, Wt, itemsize)

    # One-hot lane-permutation matrix, built once in the wrapper and kept
    # resident in VMEM via a constant index_map:  P[u*Wt + w, w*r + u] = 1.
    k = jnp.arange(r * Wt)
    tgt = (k % Wt) * r + (k // Wt)
    perm = (jnp.arange(r * Wt)[None, :] == tgt[:, None]).astype(x.dtype)

    # Explicit VMEM budget: double-buffered in/out blocks + resident P (+ slack).
    block_bytes = 2 * bt * C * Wt * itemsize            # input block (double-buffered)
    block_bytes += 2 * bt * cl * r * Wt * itemsize      # output block (double-buffered)
    block_bytes += 2 * (r * Wt) * (r * Wt) * itemsize   # permutation matrix
    vmem_limit = int(min(96 * 2**20, max(16 * 2**20, 2 * block_bytes + (2 << 20))))

    grid = (B // bt, W // Wt)
    return pl.pallas_call(
        _pixel_shuffle_1d_kernel,
        out_shape=jax.ShapeDtypeStruct((B, cl, lw), x.dtype),
        grid=grid,
        in_specs=[
            pl.BlockSpec((bt, C, Wt), lambda b, w: (b, 0, w)),
            pl.BlockSpec((r * Wt, r * Wt), lambda b, w: (0, 0)),
        ],
        out_specs=pl.BlockSpec((bt, cl, r * Wt), lambda b, w: (b, 0, w)),
        compiler_params=pltpu.CompilerParams(
            dimension_semantics=("parallel", "parallel"),
            vmem_limit_bytes=vmem_limit,
        ),
    )(x, perm)


def _reference(x, r):
    # Pure-JAX mirror of the PyTorch forward (view -> permute -> view).
    B, C, W = x.shape
    cl = C // r
    y = x.reshape(B, r, cl, W)
    y = jnp.transpose(y, (0, 2, 3, 1))
    return y.reshape(B, cl, r * W)


if __name__ == "__main__":
    key = jax.random.PRNGKey(0)

    # Small demo shape matching the module's NCW convention.
    B, C, W, r = 2, 4, 16, 2
    x = jax.random.normal(key, (B, C, W), dtype=jnp.float32)
    out = jax.block_until_ready(pixel_shuffle_1d(x, r))
    ref = _reference(x, r)
    assert out.shape == (B, C // r, r * W), out.shape
    assert out.dtype == x.dtype
    assert jnp.array_equal(out, ref), "mismatch vs reference permute (small)"

    # Second shape that exercises the width-tiled / batch-folded / resident-P path.
    key2 = jax.random.PRNGKey(1)
    B2, C2, W2, r2 = 2, 6, 256, 3
    x2 = jax.random.normal(key2, (B2, C2, W2), dtype=jnp.float32)
    out2 = jax.block_until_ready(pixel_shuffle_1d(x2, r2))
    assert out2.shape == (B2, C2 // r2, r2 * W2), out2.shape
    assert jnp.array_equal(out2, _reference(x2, r2)), "mismatch vs reference permute (tiled)"

    print("KERNEL_OK")
</pallas_src>

<mosaic_0001>
module attributes {stable_mosaic.version = 11 : i64} {
  func.func @_pixel_shuffle_1d_kernel(%arg0: i32, %arg1: i32, %arg2: memref<2x4x16xf32, #tpu.memory_space<vmem>>, %arg3: memref<32x32xf32, #tpu.memory_space<vmem>>, %arg4: memref<2x2x32xf32, #tpu.memory_space<vmem>>) attributes {dimension_semantics = [#tpu.dimension_semantics<parallel>, #tpu.dimension_semantics<parallel>], iteration_bounds = array<i64: 1, 1>, scalar_prefetch = 0 : i64, scratch_operands = 0 : i64, tpu.core_type = #tpu.core_type<tc>, window_params = [{transform_indices = @transform_0, window_bounds = array<i64: 2, 4, 16>}, {pipeline_mode = #tpu.pipeline_mode<synchronous>, transform_indices = @transform_1, window_bounds = array<i64: 32, 32>}, {transform_indices = @transform_2, window_bounds = array<i64: 2, 2, 32>}]} {
    %c0 = arith.constant 0 : index
    %c0_0 = arith.constant 0 : index
    %c0_1 = arith.constant 0 : index
    %0 = vector.load %arg2[%c0, %c0_0, %c0_1] : memref<2x4x16xf32, #tpu.memory_space<vmem>>, vector<1x2x16xf32>
    %1 = vector.shape_cast %0 : vector<1x2x16xf32> to vector<2x16xf32>
    %c0_2 = arith.constant 0 : index
    %c0_3 = arith.constant 0 : index
    %2 = vector.load %arg3[%c0_2, %c0_3] : memref<32x32xf32, #tpu.memory_space<vmem>>, vector<16x32xf32>
    %cst = arith.constant dense<0.000000e+00> : vector<2x32xf32>
    %3 = tpu.matmul %1, %2, %cst {dimension_numbers = #tpu.dot_dimension_numbers<[1], [0], [0], [1], [0, 0, 1, 1], [], []>} : vector<2x16xf32>, vector<16x32xf32>, vector<2x32xf32> -> vector<2x32xf32>
    %c0_4 = arith.constant 0 : index
    %c2 = arith.constant 2 : index
    %c0_5 = arith.constant 0 : index
    %4 = vector.load %arg2[%c0_4, %c2, %c0_5] : memref<2x4x16xf32, #tpu.memory_space<vmem>>, vector<1x2x16xf32>
    %5 = vector.shape_cast %4 : vector<1x2x16xf32> to vector<2x16xf32>
    %c16 = arith.constant 16 : index
    %c0_6 = arith.constant 0 : index
    %6 = vector.load %arg3[%c16, %c0_6] : memref<32x32xf32, #tpu.memory_space<vmem>>, vector<16x32xf32>
    %cst_7 = arith.constant dense<0.000000e+00> : vector<2x32xf32>
    %7 = tpu.matmul %5, %6, %cst_7 {dimension_numbers = #tpu.dot_dimension_numbers<[1], [0], [0], [1], [0, 0, 1, 1], [], []>} : vector<2x16xf32>, vector<16x32xf32>, vector<2x32xf32> -> vector<2x32xf32>
    %8 = arith.addf %3, %7 : vector<2x32xf32>
    %c0_8 = arith.constant 0 : index
    %c0_9 = arith.constant 0 : index
    %c0_10 = arith.constant 0 : index
    %9 = vector.load %arg4[%c0_8, %c0_9, %c0_10] : memref<2x2x32xf32, #tpu.memory_space<vmem>>, vector<1x2x32xf32>
    %10 = vector.shape_cast %9 : vector<1x2x32xf32> to vector<2x32xf32>
    %11 = vector.shape_cast %8 : vector<2x32xf32> to vector<1x2x32xf32>
    tpu.vector_store %arg4[%c0_8, %c0_9, %c0_10], %11 {strides = array<i32>} : memref<2x2x32xf32, #tpu.memory_space<vmem>>, vector<1x2x32xf32>,
    %c1 = arith.constant 1 : index
    %c0_11 = arith.constant 0 : index
    %c0_12 = arith.constant 0 : index
    %12 = vector.load %arg2[%c1, %c0_11, %c0_12] : memref<2x4x16xf32, #tpu.memory_space<vmem>>, vector<1x2x16xf32>
    %13 = vector.shape_cast %12 : vector<1x2x16xf32> to vector<2x16xf32>
    %c0_13 = arith.constant 0 : index
    %c0_14 = arith.constant 0 : index
    %14 = vector.load %arg3[%c0_13, %c0_14] : memref<32x32xf32, #tpu.memory_space<vmem>>, vector<16x32xf32>
    %cst_15 = arith.constant dense<0.000000e+00> : vector<2x32xf32>
    %15 = tpu.matmul %13, %14, %cst_15 {dimension_numbers = #tpu.dot_dimension_numbers<[1], [0], [0], [1], [0, 0, 1, 1], [], []>} : vector<2x16xf32>, vector<16x32xf32>, vector<2x32xf32> -> vector<2x32xf32>
    %c1_16 = arith.constant 1 : index
    %c2_17 = arith.constant 2 : index
    %c0_18 = arith.constant 0 : index
    %16 = vector.load %arg2[%c1_16, %c2_17, %c0_18] : memref<2x4x16xf32, #tpu.memory_space<vmem>>, vector<1x2x16xf32>
    %17 = vector.shape_cast %16 : vector<1x2x16xf32> to vector<2x16xf32>
    %c16_19 = arith.constant 16 : index
    %c0_20 = arith.constant 0 : index
    %18 = vector.load %arg3[%c16_19, %c0_20] : memref<32x32xf32, #tpu.memory_space<vmem>>, vector<16x32xf32>
    %cst_21 = arith.constant dense<0.000000e+00> : vector<2x32xf32>
    %19 = tpu.matmul %17, %18, %cst_21 {dimension_numbers = #tpu.dot_dimension_numbers<[1], [0], [0], [1], [0, 0, 1, 1], [], []>} : vector<2x16xf32>, vector<16x32xf32>, vector<2x32xf32> -> vector<2x32xf32>
    %20 = arith.addf %15, %19 : vector<2x32xf32>
    %c1_22 = arith.constant 1 : index
    %c0_23 = arith.constant 0 : index
    %c0_24 = arith.constant 0 : index
    %21 = vector.load %arg4[%c1_22, %c0_23, %c0_24] : memref<2x2x32xf32, #tpu.memory_space<vmem>>, vector<1x2x32xf32>
    %22 = vector.shape_cast %21 : vector<1x2x32xf32> to vector<2x32xf32>
    %23 = vector.shape_cast %20 : vector<2x32xf32> to vector<1x2x32xf32>
    tpu.vector_store %arg4[%c1_22, %c0_23, %c0_24], %23 {strides = array<i32>} : memref<2x2x32xf32, #tpu.memory_space<vmem>>, vector<1x2x32xf32>,
    return
  }
  func.func @transform_0(%arg0: i32, %arg1: i32) -> (i32, i32, i32) {
    %c0_i32 = arith.constant 0 : i32
    %c0_i32_0 = arith.constant 0 : i32
    return %arg0, %c0_i32, %arg1 : i32, i32, i32
  }
  func.func @transform_1(%arg0: i32, %arg1: i32) -> (i32, i32) {
    %c0_i32 = arith.constant 0 : i32
    %c0_i32_0 = arith.constant 0 : i32
    %c0_i32_1 = arith.constant 0 : i32
    return %c0_i32, %c0_i32_0 : i32, i32
  }
  func.func @transform_2(%arg0: i32, %arg1: i32) -> (i32, i32, i32) {
    %c0_i32 = arith.constant 0 : i32
    %c0_i32_0 = arith.constant 0 : i32
    return %arg0, %c0_i32, %arg1 : i32, i32, i32
  }
}

</mosaic_0001>

<bundles_post_ra>
// kernel: tpu_custom_call.1
= control target key start
LH: loop header
LB: loop body
LE: loop exit
PB: predicated region body
PF: predicated region fallthrough
CT: control target
= control target key end

     0   :  { %7 = vsyncpa [#allocation3], 0  ;;  %s579_s0 = inlined_call_operand.hbm [shape: f32[2,4,16], index: 0, kind: input, shape index: {}]   ;;  %s580_s1 = inlined_call_operand.hbm [shape: f32[32,32], index: 1, kind: input, shape index: {}]   ;;  %s581_s2 = inlined_call_operand.hbm [shape: f32[2,2,32], index: 2, kind: output, shape index: {}]  }
   0x1   :  { %8 = vsyncpa [#allocation6], 0 }
   0x2   :  { %9 = vsyncpa [#allocation4], 0  ;;  %s512_s9 = smov [#allocation2]   ;;  %s440_s13 = scalar_lea.hbm %s579_s0, 128 }
   0x3   :  { %s15_s10 = sshll.u32 %s512_s9, 4  ;;  %p441_p0 = scmp.ne.s32.totalorder %s579_s0, %s440_s13  ;;  %s16_s10 = int_to_ptr.vmem [resolvable:$true] %s15_s10 }
   0x4   :  { %p444_p1 = scmp.lt.u32.totalorder %s440_s13, %s579_s0 }
   0x6   :  { %p446_p2 = pnand %p444_p1, %p441_p0 }
   0x8   :  { %449 = shalt.err (!%p446_p2)
}
   0x9   :  { %s450_s18 = scalar_lea.vmem %s16_s10, 128  ;;  %p455_p4 = scmp.lt.s32.totalorder %s16_s10, %s16_s10 }
   0xa   :  { %p451_p3 = scmp.ne.s32.totalorder %s16_s10, %s450_s18  ;;  %p456_p5 = scmp.lt.s32.totalorder %s450_s18, %s450_s18 }
   0xc   :  { %p457_p6 = por %p456_p5, %p455_p4 }
   0xe   :  { %p458_p7 = pnand %p457_p6, %p451_p3 }
  0x10   :  { %461 = shalt.err (!%p458_p7)
}
  0x11   :  { %s513_s19 = smov 64   ;;  %s514_s20 = smov 4  }
  0x12   :  { %21 = dma.hbm_to_vmem [thread:$0]  %s579_s0, 128, %s16_s10, [#allocation3], %s513_s19, %s513_s19, %s514_s20  }
  0x13   :  { %s515_s23 = smov [#allocation5]   ;;  %s462_s27 = scalar_lea.hbm %s580_s1, 512 }
  0x14   :  { %s27_s24 = sshll.u32 %s515_s23, 4  ;;  %p463_p8 = scmp.ne.s32.totalorder %s580_s1, %s462_s27  ;;  %s28_s24 = int_to_ptr.vmem [resolvable:$true] %s27_s24 }
  0x15   :  { %p466_p9 = scmp.lt.u32.totalorder %s462_s27, %s580_s1 }
  0x17   :  { %p468_p10 = pnand %p466_p9, %p463_p8 }
  0x19   :  { %471 = shalt.err (!%p468_p10)
}
  0x1a   :  { %s472_s4 = scalar_lea.vmem %s28_s24, 512  ;;  %p477_p12 = scmp.lt.s32.totalorder %s28_s24, %s28_s24 }
  0x1b   :  { %p473_p11 = scmp.ne.s32.totalorder %s28_s24, %s472_s4  ;;  %p478_p13 = scmp.lt.s32.totalorder %s472_s4, %s472_s4 }
  0x1d   :  { %p479_p0 = por %p478_p13, %p477_p12 }
  0x1f   :  { %p480_p1 = pnand %p479_p0, %p473_p11 }
  0x21   :  { %483 = shalt.err (!%p480_p1)
}
  0x22   :  { %s516_s0 = smov 128   ;;  %s517_s5 = smov 8  }
  0x23   :  { %33 = dma.hbm_to_vmem [thread:$0]  %s580_s1, 512, %s28_s24, [#allocation6], %s516_s0, %s516_s0, %s517_s5  }
  0x24   :  { %506 = dma.done.wait [#allocation3], 128  }
  0x25   :  { %507 = vsyncadd [#allocation3], 4294967168 }
  0x26   :  { %508 = dma.done.wait [#allocation6], 512  }
  0x27   :  { %509 = vsyncadd [#allocation6], 4294966784  ;;  %v518_v0 = vmov 0.0|0.0   ;;  %vm519_vm0 = vmmov 0   ;;  %v520_v1 = vmov 0.0   ;;  %v44_v2 = vld [vmem:[#allocation5 + $0x10] sm:$0xff] }
  0x28   :  { %412 = vmatprep.subr.bf16.mxu0 %v518_v0  ;;  %418 = vmatprep.subr.bf16.mxu1 %v518_v0  ;;  %v45_v3 = vld [vmem:[#allocation5 + $0x18] sm:$0xff]  ;;  %v41_v5 = vld [vmem:[#allocation5] sm:$0xff]  ;;  %v42_v6 = vld [vmem:[#allocation5 + $0x8] sm:$0xff]  ;;  %vm46_vm1 = vcmask 130048   ;;  %s521_s1 = smov [#allocation7]   ;;  %vm193_vm2 = vcmask 254976  }
  0x29   :  { %388 = vmatprep.mubr.msk.f32.mxu0 %vm519_vm0, %v520_v1  ;;  %402 = vmatprep.mubr.msk.f32.mxu1 %vm519_vm0, %v520_v1  ;;  %v413_v4 = vpack.c.bf16 %v45_v3, %v44_v2  ;;  %v43_v7 = vld [vmem:[#allocation2 + $0x2] sm:$0x3]  ;;  %v199_v8 = vld [vmem:[#allocation2 + $0x6] sm:$0x3]  ;;  %v416_v9 = vpack.c.bf16 %v42_v6, %v41_v5  ;;  %v40_v10 = vld [vmem:[#allocation2] sm:$0x3] }
  0x2a   :  { %v196_v11 = vld [vmem:[#allocation2 + $0x4] sm:$0x3]  ;;  %s355_s8 = sshll.u32 %s521_s1, 4  ;;  %s356_s8 = int_to_ptr.vmem [resolvable:$true] %s355_s8 }
  0x2b   :  { %414 = vmatpush3.bf16.msra.mxu0 %v413_v4  ;;  %420 = vmatpush3.bf16.msra.mxu1 %v413_v4  ;;  %s484_s9 = scalar_lea.vmem %s356_s8, 64  ;;  %p489_p3 = scmp.lt.s32.totalorder %s356_s8, %s356_s8 }
  0x2c   :  { %415 = vmatprep.subr.bf16.mxu0 %v518_v0  ;;  %421 = vmatprep.subr.bf16.mxu1 %v518_v0  ;;  %p485_p2 = scmp.ne.s32.totalorder %s356_s8, %s484_s9  ;;  %p490_p4 = scmp.lt.s32.totalorder %s484_s9, %s484_s9 }
  0x2e   :  { %389 = vmatmul.mubr.msk.f32.vlgmr.msra.gmra.mrb[0].mxu0 %vm46_vm1, %v43_v7  ;;  %403 = vmatmul.mubr.msk.f32.vlgmr.msra.gmra.mrb[0].mxu1 %vm46_vm1, %v199_v8  ;;  %p491_p5 = por %p490_p4, %p489_p3 }
  0x2f   :  { %417 = vmatpush3.bf16.msra.mxu0 %v416_v9  ;;  %423 = vmatpush3.bf16.msra.mxu1 %v416_v9 }
  0x30   :  { %395 = vmatprep.mubr.msk.f32.mxu0 %vm519_vm0, %v520_v1  ;;  %409 = vmatprep.mubr.msk.f32.mxu1 %vm519_vm0, %v520_v1  ;;  %p492_p6 = pnand %p491_p5, %p485_p2 }
  0x36   :  { %396 = vmatmul.mubr.msk.f32.vlgmr.msra.gmra.mrb[0].mxu0 %vm46_vm1, %v40_v10  ;;  %410 = vmatmul.mubr.msk.f32.vlgmr.msra.gmra.mrb[0].mxu1 %vm46_vm1, %v196_v11 }
 0x109   :  { %v189_v12 = vpop.f32.mrb[0].mxu0  ;;  %v344_v13 = vpop.f32.mrb[0].mxu1 }
 0x10a   :  { %194 = vst.msk [vmem:[#allocation7] sm:$0x3] %vm193_vm2, %v189_v12  ;;  %349 = vst.msk [vmem:[#allocation7 + $0x2] sm:$0x3] %vm193_vm2, %v344_v13  ;;  %v397_v14 = vpop.f32.mrb[1].mxu0  ;;  %v411_v15 = vpop.f32.mrb[1].mxu1 }
 0x10b   :  { %495 = shalt.err (!%p492_p6)
}
 0x10c   :  { %s496_s12 = scalar_lea.hbm %s581_s2, 64 }
 0x10d   :  { %p497_p7 = scmp.ne.s32.totalorder %s581_s2, %s496_s12  ;;  %p500_p8 = scmp.lt.u32.totalorder %s496_s12, %s581_s2 }
 0x10f   :  { %p502_p9 = pnand %p500_p8, %p497_p7 }
 0x111   :  { %505 = shalt.err (!%p502_p9)
}
 0x112   :  { %s522_s17 = smov 32   ;;  %s523_s18 = smov 2  }
 0x113   :  { %361 = dma.vmem_to_hbm [thread:$0]  %s356_s8, 64, %s581_s2, [#allocation4], %s522_s17, %s522_s17, %s523_s18  }
 0x114   :  { %510 = dma.done.wait [#allocation4], 64  }
 0x115   :  { %511 = vsyncadd [#allocation4], 4294967232 }
 0x116   :  { %365 = vsyncpa [#allocation3], 1 }
 0x117   :  { %366 = vsyncpa [#allocation6], 1 }
 0x118   :  { %367 = vsyncpa [#allocation4], 1 }

</bundles_post_ra>
